<compile_context>
chip_gen: v5e
topology: v5e:2x2
jax: 0.10.0
libtpu: 0.0.40
codegen_flags: <defaults>
</compile_context>

<pallas_src>
import functools

import jax
import jax.numpy as jnp
from jax import lax
from jax.experimental import pallas as pl
from jax.experimental.pallas import tpu as pltpu

_LANES = 128
_ACC_SUBLANES = 8


def _ce_kernel(logits_ref, tgt_ref, out_ref, *, n_total, tn, tiles_per_core):
    p = pl.program_id(0)          # parallel partition (separate TensorCore on v7x)
    i = pl.program_id(1)          # tile index within this partition (reduction axis)

    @pl.when(i == 0)
    def _init():
        out_ref[...] = jnp.zeros_like(out_ref)

    # Stream in native dtype; cast per tile inside the kernel.
    x = logits_ref[...].astype(jnp.float32)                      # (TN, C)
    t = tgt_ref[...]                                             # (TN, 1) int32
    rows, c = x.shape

    # Stable log-softmax pieces; the row_max terms cancel between logsumexp and the
    # gathered target logit, so they are never added back.
    row_max = jnp.max(x, axis=-1, keepdims=True)                 # (TN, 1)
    shifted = x - row_max                                        # (TN, C), <= 0
    sumexp = jnp.sum(jnp.exp(shifted), axis=-1, keepdims=True)   # (TN, 1)

    # Target gather: (1, C) class iota broadcast inside the compare (no (TN, C) temp).
    classes = lax.broadcasted_iota(jnp.int32, (1, c), 1)         # (1, C)
    x_tgt_shifted = jnp.sum(
        jnp.where(classes == t, shifted, 0.0), axis=-1, keepdims=True)

    per_row = jnp.log(sumexp) - x_tgt_shifted                    # (TN, 1)

    # Mask rows beyond N (ragged final tile / overhanging partition tiles).
    tile_idx = p * tiles_per_core + i
    row_ids = tile_idx * tn + lax.broadcasted_iota(jnp.int32, (rows, 1), 0)
    per_row = jnp.where(row_ids < n_total, per_row, 0.0)

    # Lane-dense resident accumulator: same running sum splatted across the block.
    out_ref[...] += jnp.sum(per_row)

    @pl.when(i == pl.num_programs(1) - 1)
    def _finalize():
        out_ref[...] = out_ref[...] / jnp.float32(n_total)


def _round_up(x, m):
    return ((x + m - 1) // m) * m


def _pick_batch_tile(n, c, itemsize):
    """Largest batch tile whose double-buffered input + f32 temps fit ~24 MiB."""
    # Dtype-aware sublane multiple: 8 rows f32, 16 bf16, 32 int8/fp8.
    sub = max(8, 32 // itemsize)

    budget = 24 * 1024 * 1024
    per_row = c * (2 * itemsize + 3 * 4)      # 2x input buffers + ~3 f32 temps
    tn = max(sub, (budget // max(per_row, 1)) // sub * sub)

    # Keep at least 2 tiles (v7x 2-TC split) and ideally 4 (DMA/compute overlap)
    # when the batch is big enough; extra cost elsewhere is ~0.35us per grid step.
    if n >= 4 * sub:
        tn = min(tn, _round_up(-(-n // 4), sub))
    elif n >= 2 * sub:
        tn = min(tn, _round_up(-(-n // 2), sub))

    if tn >= n:
        return n                               # single full-dim block: always legal
    return tn


def cross_entropy_loss(logits: jax.Array, targets: jax.Array) -> jax.Array:
    """Mean cross-entropy over the batch (== nn.CrossEntropyLoss()(logits, targets))."""
    n, c = logits.shape
    tgt2d = targets.astype(jnp.int32).reshape(n, 1)

    itemsize = jnp.dtype(logits.dtype).itemsize
    tn = _pick_batch_tile(n, c, itemsize)
    n_tiles = pl.cdiv(n, tn)
    num_parts = min(2, n_tiles)                # feeds both TensorCores on v7x
    tiles_per_core = pl.cdiv(n_tiles, num_parts)
    grid = (num_parts, tiles_per_core)
    last_tile = n_tiles - 1

    def in_map(p, i):
        # Clamp overhanging partition tiles; their rows get masked in the kernel.
        return (jnp.minimum(p * tiles_per_core + i, last_tile), 0)

    kernel = functools.partial(
        _ce_kernel, n_total=n, tn=tn, tiles_per_core=tiles_per_core)

    # Explicit scoped-VMEM limit matching the chosen tile (v5e default is 16 MiB);
    # capped at 64 MiB to stay inside v7x physical VMEM.
    need = (2 * tn * c * itemsize              # double-buffered logits
            + 2 * tn * 4                       # double-buffered targets
            + 3 * tn * c * 4                   # f32 temporaries
            + (2 << 20))                       # output blocks + slack
    vmem_limit = int(min(max(need, 32 * 1024 * 1024), 64 * 1024 * 1024))

    cost = pl.CostEstimate(
        flops=5 * n * c,
        transcendentals=n * c + n,             # exp per element + log per row
        bytes_accessed=n * c * itemsize + n * 4
        + num_parts * _ACC_SUBLANES * _LANES * 4,
    )

    out = pl.pallas_call(
        kernel,
        out_shape=jax.ShapeDtypeStruct((num_parts, _ACC_SUBLANES, _LANES),
                                       jnp.float32),
        grid_spec=pltpu.PrefetchScalarGridSpec(
            num_scalar_prefetch=0,
            grid=grid,
            in_specs=[
                pl.BlockSpec((tn, c), in_map),
                pl.BlockSpec((tn, 1), in_map),
            ],
            out_specs=pl.BlockSpec((1, _ACC_SUBLANES, _LANES),
                                   lambda p, i: (p, 0, 0)),
        ),
        compiler_params=pltpu.CompilerParams(
            dimension_semantics=("parallel", "arbitrary"),
            vmem_limit_bytes=vmem_limit,
        ),
        cost_estimate=cost,
    )(logits, tgt2d)

    # Each partition's block already holds its partial / N in every lane.
    return jnp.sum(out[:, 0, 0])


if __name__ == "__main__":
    key = jax.random.PRNGKey(0)
    k1, k2, k3, k4 = jax.random.split(key, 4)

    def ref_loss(lg, tg):
        lp = jax.nn.log_softmax(lg.astype(jnp.float32), axis=-1)
        return -jnp.mean(lp[jnp.arange(lg.shape[0]), tg])

    # Case 1: tiny single-tile batch (module-default CE usage).
    N, C = 8, 32
    logits = jax.random.normal(k1, (N, C), dtype=jnp.float32)
    targets = jax.random.randint(k2, (N,), 0, C, dtype=jnp.int32)
    loss = cross_entropy_loss(logits, targets)
    jax.block_until_ready(loss)
    assert jnp.allclose(loss, ref_loss(logits, targets), atol=1e-4, rtol=1e-5), loss

    # Case 2: ragged final tile + two-partition grid (N not a multiple of the tile).
    N2, C2 = 20, 160
    logits2 = jax.random.normal(k3, (N2, C2), dtype=jnp.float32)
    targets2 = jax.random.randint(k4, (N2,), 0, C2, dtype=jnp.int32)
    loss2 = cross_entropy_loss(logits2, targets2)
    jax.block_until_ready(loss2)
    assert jnp.allclose(loss2, ref_loss(logits2, targets2), atol=1e-4, rtol=1e-5), loss2

    print("KERNEL_OK")
</pallas_src>

<mosaic_0001>
module attributes {stable_mosaic.version = 11 : i64} {
  func.func @_ce_kernel(%arg0: i32, %arg1: i32, %arg2: memref<8x32xf32, #tpu.memory_space<vmem>>, %arg3: memref<8x1xi32, #tpu.memory_space<vmem>>, %arg4: memref<1x8x128xf32, #tpu.memory_space<vmem>>) attributes {dimension_semantics = [#tpu.dimension_semantics<parallel>, #tpu.dimension_semantics<arbitrary>], iteration_bounds = array<i64: 1, 1>, scalar_prefetch = 0 : i64, scratch_operands = 0 : i64, tpu.core_type = #tpu.core_type<tc>, window_params = [{transform_indices = @transform_0, window_bounds = array<i64: 8, 32>}, {transform_indices = @transform_1, window_bounds = array<i64: 8, 1>}, {transform_indices = @transform_2, window_bounds = array<i64: 1, 8, 128>}]} {
    %c0_i32 = arith.constant 0 : i32
    %0 = arith.cmpi eq, %arg1, %c0_i32 : i32
    %1 = arith.extui %0 : i1 to i32
    %c0_i32_0 = arith.constant 0 : i32
    %2 = arith.cmpi ne, %1, %c0_i32_0 : i32
    scf.if %2 {
      %cst_18 = arith.constant 0.000000e+00 : f32
      %43 = vector.broadcast %cst_18 : f32 to vector<1x8x128xf32>
      %c0_19 = arith.constant 0 : index
      %c0_20 = arith.constant 0 : index
      %c0_21 = arith.constant 0 : index
      %44 = vector.load %arg4[%c0_19, %c0_20, %c0_21] : memref<1x8x128xf32, #tpu.memory_space<vmem>>, vector<1x8x128xf32>
      tpu.vector_store %arg4[%c0_19, %c0_20, %c0_21], %43 {strides = array<i32>} : memref<1x8x128xf32, #tpu.memory_space<vmem>>, vector<1x8x128xf32>,
    } else {
    }
    %c0 = arith.constant 0 : index
    %c0_1 = arith.constant 0 : index
    %3 = vector.load %arg2[%c0, %c0_1] : memref<8x32xf32, #tpu.memory_space<vmem>>, vector<8x32xf32>
    %c0_2 = arith.constant 0 : index
    %c0_3 = arith.constant 0 : index
    %4 = vector.load %arg3[%c0_2, %c0_3] : memref<8x1xi32, #tpu.memory_space<vmem>>, vector<8x1xi32>
    %cst = arith.constant dense<0xFF800000> : vector<8xf32>
    %5 = vector.multi_reduction <maximumf>, %3, %cst [1] : vector<8x32xf32> to vector<8xf32>
    %6 = vector.shape_cast %5 : vector<8xf32> to vector<8x1xf32>
    %7 = vector.broadcast %6 : vector<8x1xf32> to vector<8x32xf32>
    %8 = arith.subf %3, %7 : vector<8x32xf32>
    %9 = math.exp %8 : vector<8x32xf32>
    %cst_4 = arith.constant dense<0.000000e+00> : vector<8xf32>
    %10 = vector.multi_reduction <add>, %9, %cst_4 [1] : vector<8x32xf32> to vector<8xf32>
    %11 = vector.shape_cast %10 : vector<8xf32> to vector<8x1xf32>
    %12 = tpu.iota {dimensions = array<i32: 1>} : vector<1x32xi32>
    %13 = vector.broadcast %12 : vector<1x32xi32> to vector<8x32xi32>
    %14 = vector.broadcast %4 : vector<8x1xi32> to vector<8x32xi32>
    %15 = arith.cmpi eq, %13, %14 : vector<8x32xi32>
    %cst_5 = arith.constant 0.000000e+00 : f32
    %16 = vector.broadcast %cst_5 : f32 to vector<8x32xf32>
    %17 = arith.select %15, %8, %16 : vector<8x32xi1>, vector<8x32xf32>
    %cst_6 = arith.constant dense<0.000000e+00> : vector<8xf32>
    %18 = vector.multi_reduction <add>, %17, %cst_6 [1] : vector<8x32xf32> to vector<8xf32>
    %19 = vector.shape_cast %18 : vector<8xf32> to vector<8x1xf32>
    %20 = math.log %11 : vector<8x1xf32>
    %21 = arith.subf %20, %19 : vector<8x1xf32>
    %c1_i32 = arith.constant 1 : i32
    %22 = arith.muli %arg0, %c1_i32 : i32
    %23 = arith.addi %22, %arg1 : i32
    %c8_i32 = arith.constant 8 : i32
    %24 = arith.muli %23, %c8_i32 : i32
    %25 = tpu.iota {dimensions = array<i32: 0>} : vector<8x1xi32>
    %26 = vector.broadcast %24 : i32 to vector<8x1xi32>
    %27 = arith.addi %26, %25 : vector<8x1xi32>
    %c8_i32_7 = arith.constant 8 : i32
    %28 = vector.broadcast %c8_i32_7 : i32 to vector<8x1xi32>
    %29 = arith.cmpi slt, %27, %28 : vector<8x1xi32>
    %cst_8 = arith.constant 0.000000e+00 : f32
    %30 = vector.broadcast %cst_8 : f32 to vector<8x1xf32>
    %31 = arith.select %29, %21, %30 : vector<8x1xi1>, vector<8x1xf32>
    %c0_9 = arith.constant 0 : index
    %c0_10 = arith.constant 0 : index
    %c0_11 = arith.constant 0 : index
    %32 = vector.load %arg4[%c0_9, %c0_10, %c0_11] : memref<1x8x128xf32, #tpu.memory_space<vmem>>, vector<1x8x128xf32>
    %33 = vector.shape_cast %31 : vector<8x1xf32> to vector<1x8x1xf32>
    %cst_12 = arith.constant dense<0.000000e+00> : vector<1xf32>
    %34 = vector.multi_reduction <add>, %33, %cst_12 [1, 2] : vector<1x8x1xf32> to vector<1xf32>
    %35 = vector.shape_cast %34 : vector<1xf32> to vector<1x1x1xf32>
    %36 = vector.extract %35[0, 0, 0] : f32 from vector<1x1x1xf32>
    %37 = vector.broadcast %36 : f32 to vector<1x8x128xf32>
    %38 = arith.addf %32, %37 : vector<1x8x128xf32>
    %c0_13 = arith.constant 0 : index
    %c0_14 = arith.constant 0 : index
    %c0_15 = arith.constant 0 : index
    %39 = vector.load %arg4[%c0_13, %c0_14, %c0_15] : memref<1x8x128xf32, #tpu.memory_space<vmem>>, vector<1x8x128xf32>
    tpu.vector_store %arg4[%c0_13, %c0_14, %c0_15], %38 {strides = array<i32>} : memref<1x8x128xf32, #tpu.memory_space<vmem>>, vector<1x8x128xf32>,
    %c0_i32_16 = arith.constant 0 : i32
    %40 = arith.cmpi eq, %arg1, %c0_i32_16 : i32
    %41 = arith.extui %40 : i1 to i32
    %c0_i32_17 = arith.constant 0 : i32
    %42 = arith.cmpi ne, %41, %c0_i32_17 : i32
    scf.if %42 {
      %c0_18 = arith.constant 0 : index
      %c0_19 = arith.constant 0 : index
      %c0_20 = arith.constant 0 : index
      %43 = vector.load %arg4[%c0_18, %c0_19, %c0_20] : memref<1x8x128xf32, #tpu.memory_space<vmem>>, vector<1x8x128xf32>
      %cst_21 = arith.constant 8.000000e+00 : f32
      %44 = vector.broadcast %cst_21 : f32 to vector<1x8x128xf32>
      %45 = arith.divf %43, %44 : vector<1x8x128xf32>
      %c0_22 = arith.constant 0 : index
      %c0_23 = arith.constant 0 : index
      %c0_24 = arith.constant 0 : index
      %46 = vector.load %arg4[%c0_22, %c0_23, %c0_24] : memref<1x8x128xf32, #tpu.memory_space<vmem>>, vector<1x8x128xf32>
      tpu.vector_store %arg4[%c0_22, %c0_23, %c0_24], %45 {strides = array<i32>} : memref<1x8x128xf32, #tpu.memory_space<vmem>>, vector<1x8x128xf32>,
    } else {
    }
    return
  }
  func.func @transform_0(%arg0: i32, %arg1: i32) -> (i32, i32) {
    %c1_i32 = arith.constant 1 : i32
    %0 = arith.muli %arg0, %c1_i32 : i32
    %1 = arith.addi %0, %arg1 : i32
    %c0_i32 = arith.constant 0 : i32
    %2 = arith.minsi %1, %c0_i32 : i32
    %c0_i32_0 = arith.constant 0 : i32
    %c0_i32_1 = arith.constant 0 : i32
    return %2, %c0_i32_0 : i32, i32
  }
  func.func @transform_1(%arg0: i32, %arg1: i32) -> (i32, i32) {
    %c1_i32 = arith.constant 1 : i32
    %0 = arith.muli %arg0, %c1_i32 : i32
    %1 = arith.addi %0, %arg1 : i32
    %c0_i32 = arith.constant 0 : i32
    %2 = arith.minsi %1, %c0_i32 : i32
    %c0_i32_0 = arith.constant 0 : i32
    %c0_i32_1 = arith.constant 0 : i32
    return %2, %c0_i32_0 : i32, i32
  }
  func.func @transform_2(%arg0: i32, %arg1: i32) -> (i32, i32, i32) {
    %c0_i32 = arith.constant 0 : i32
    %c0_i32_0 = arith.constant 0 : i32
    %c0_i32_1 = arith.constant 0 : i32
    return %arg0, %c0_i32, %c0_i32_0 : i32, i32, i32
  }
}

</mosaic_0001>

<bundles_post_ra>
// kernel: tpu_custom_call.1
= control target key start
LH: loop header
LB: loop body
LE: loop exit
PB: predicated region body
PF: predicated region fallthrough
CT: control target
= control target key end

     0   :  { %vm73_vm0 = vcmask 261120   ;;  %s229_s0 = inlined_call_operand.vmem [shape: f32[8,32], index: 0, kind: input, shape index: {}]   ;;  %s230_s1 = inlined_call_operand.vmem [shape: s32[8,1], index: 1, kind: input, shape index: {}]   ;;  %s231_s2 = inlined_call_operand.hbm [shape: f32[1,8,128], index: 2, kind: output, shape index: {}]  }
   0x1   :  { %v71_v0 = vld [vmem:[%s229_s0] sm:$0xff] }
   0x2   :  { %7 = vsyncpa [#allocation3], 0  ;;  %v74_v1 = vsel %vm73_vm0, %v71_v0, -inf  ;;  %v199_v2 = vmov 0   ;;  %v72_v3 = vld [vmem:[%s230_s1] sm:$0xff]  ;;  %v83_v9 = vlaneseq  ;;  %vm105_vm2 = vcmask 7168  }
   0x3   :  { %166 = vset.pattern.permute.xlu0 %v199_v2  ;;  %v200_v27 = vmov 8.0   ;;  %s201_s1 = smov [#allocation2]   ;;  %s139_s16 = sshll.u32 %s231_s2, 4  ;;  %s140_s16 = int_to_ptr.hbm [resolvable:$true] %s139_s16 }
   0x4   :  { %75 = vmax.xlane.f32.xlu0 %v74_v1  ;;  %v84_v10 = vand.u32 127, %v83_v9  ;;  %s137_s13 = sshll.u32 %s201_s1, 4  ;;  %s138_s13 = int_to_ptr.vmem [resolvable:$true] %s137_s13 }
  0x18   :  { %86 = vperm.xlu0 %166, %v72_v3  }
  0x77   :  { %v76_v4 = vpop.xlane.xlu0 %75 }
  0x78   :  { %v77_v5 = vsub.f32 %v71_v0, %v76_v4 }
  0x7a   :  { %v78_v6 = vmul.f32 1.442695, %v77_v5 }
  0x7c   :  { %167 = vpow2.f32 %v78_v6 }
  0x82   :  { %v168_v7 = vpop.eup %167 }
  0x83   :  { %v80_v8 = vsel %vm73_vm0, %v168_v7, 0.0 }
  0x84   :  { %81 = vadd.xlane.f32.xlu1 %v80_v8 }
  0x8a   :  { %v87_v11 = vpop.permute.xlu0 %86 }
  0x8b   :  { %vm88_vm1 = vcmp.eq.s32.totalorder %v84_v10, %v87_v11 }
  0x8c   :  { %v89_v12 = vsel %vm88_vm1, %v77_v5, 0.0 }
  0x8d   :  { %v90_v13 = vsel %vm73_vm0, %v89_v12, 0.0 }
  0x8e   :  { %91 = vadd.xlane.f32.xlu1 %v90_v13 }
  0xf7   :  { %v82_v14 = vpop.xlane.xlu1 %81 }
  0xf8   :  { %169 = vlog2.f32 %v82_v14 }
  0xf9   :  { %171 = vrcp.f32 %v200_v27 }
  0xfe   :  { %v170_v15 = vpop.eup %169 }
  0xff   :  { %v94_v16 = vmul.f32 0.6931472, %v170_v15  ;;  %v172_v28 = vpop.eup %171 }
 0x100   :  { %v124_v29 = vmul.f32 8.0, %v172_v28  ;;  %vm128_vm3 = vweird.f32 %v172_v28 }
 0x101   :  { %v92_v17 = vpop.xlane.xlu1 %91 }
 0x102   :  { %v95_v18 = vsub.f32 %v94_v16, %v92_v17  ;;  %v125_v30 = vsub.f32 1.0, %v124_v29 }
 0x104   :  { %v106_v19 = vsel %vm105_vm2, %v95_v18, 0.0  ;;  %v126_v31 = vmul.f32 %v172_v28, %v125_v30 }
 0x105   :  { %107 = vadd.xlane.f32.xlu2 %v106_v19 }
 0x106   :  { %v127_v32 = vadd.f32 %v172_v28, %v126_v31 }
 0x108   :  { %v129_v34 = vsel %vm128_vm3, %v172_v28, %v127_v32 }
 0x178   :  { %v108_v20 = vpop.xlane.xlu2 %107 }
 0x179   :  { %v109_v21 = vrot.slane %v108_v20, 4 }
 0x17b   :  { %v110_v22 = vadd.f32 %v109_v21, %v108_v20 }
 0x17d   :  { %v111_v23 = vrot.slane %v110_v22, 2 }
 0x17f   :  { %v112_v24 = vadd.f32 %v111_v23, %v110_v22 }
 0x181   :  { %v113_v25 = vrot.slane %v112_v24, 1 }
 0x183   :  { %v114_v26 = vadd.f32 %v113_v25, %v112_v24 }
 0x185   :  { %160 = vpush %v114_v26 }
 0x1b6   :  { %s161_s0 = spop %160 }
 0x1b7   :  { %v116_v33 = vstv %s161_s0 }
 0x1b8   :  { %v130_v35 = vmul.f32 %v129_v34, %v116_v33 }
 0x1ba   :  { %131 = vst [vmem:[#allocation2] sm:$0xff] %v130_v35 }
 0x1bb   :  { %142 = dma.vmem_to_hbm [thread:$0]  %s138_s13, 128, %s140_s16, [#allocation3]  }
 0x1bc   :  { %197 = dma.done.wait [#allocation3], 128  }
 0x1bd   :  { %198 = vsyncadd [#allocation3], 4294967168 }
 0x1be   :  { %147 = vsyncpa [#allocation3], 1 }

</bundles_post_ra>
